<compile_context>
chip_gen: v6e
topology: v6e:2x2x1
jax: 0.10.0
libtpu: 0.0.40
codegen_flags: <defaults>
</compile_context>

<pallas_src>
import jax
import jax.numpy as jnp
from jax.experimental import pallas as pl
from jax.experimental.pallas import tpu as pltpu

# Offsets of the intermediate tensors inside the final output.
_X_TOP, _X_BOT, _X_LEFT, _X_RIGHT = 9, 8, 6, 6   # original x region
_P0_TOP, _P0_LEFT = 7, 4                         # pad_0 output (size H+4, W+4)
_P1_TOP, _P1_LEFT = 2, 1                         # pad_1 output (rest of the tensor)


def _pad_kernel(x_ref, o_ref):
    # x_ref: (C, H, W), o_ref: (C, Ho, Wo) -- all planes of this grid step at once.
    C, H, W = x_ref.shape
    _, Ho, Wo = o_ref.shape
    dt = o_ref.dtype

    # Channel-invariant border pattern built on a single (1, Ho, Wo) plane.
    row = jax.lax.broadcasted_iota(jnp.int32, (1, Ho, Wo), 1)
    col = jax.lax.broadcasted_iota(jnp.int32, (1, Ho, Wo), 2)

    # pad_1's output region inside the final tensor (pad_2 only adds top=2, left=1).
    in_pad1 = (row >= _P1_TOP) & (col >= _P1_LEFT)
    # pad_0's output region: offset (7, 4), size (H+4, W+4).
    in_pad0 = ((row >= _P0_TOP) & (row < _P0_TOP + H + 4)
               & (col >= _P0_LEFT) & (col < _P0_LEFT + W + 4))

    border = jnp.where(in_pad0, jnp.asarray(0.1, dt),
                       jnp.where(in_pad1, jnp.asarray(-2.0, dt),
                                 jnp.asarray(0.0, dt)))

    # 1) Full-block store of the constant frame (broadcast over channels).
    o_ref[...] = jnp.broadcast_to(border, o_ref.shape)
    # 2) Static interior sub-window store of x (values inside the x region
    #    override the 0.1 frame written above, matching the pad composition).
    o_ref[:, _X_TOP:_X_TOP + H, _X_LEFT:_X_LEFT + W] = x_ref[...]


def constant_pad2d_model(x):
    N, C, H, W = x.shape
    Ho = H + _X_TOP + _X_BOT
    Wo = W + _X_LEFT + _X_RIGHT
    NC = N * C
    xf = x.reshape(NC, H, W)

    # Single grid step by default (this kernel is launch-overhead bound).  Only
    # split into two "parallel" steps -- useful solely on v7x's two TensorCores --
    # when each half of the output is big enough to amortize a second dispatch.
    out_bytes = NC * Ho * Wo * jnp.dtype(x.dtype).itemsize
    steps = 2 if (NC % 2 == 0 and NC >= 2 and out_bytes // 2 >= (256 << 10)) else 1
    chunk = NC // steps

    out = pl.pallas_call(
        _pad_kernel,
        out_shape=jax.ShapeDtypeStruct((NC, Ho, Wo), x.dtype),
        grid=(steps,),
        in_specs=[pl.BlockSpec((chunk, H, W), lambda i: (i, 0, 0))],
        out_specs=pl.BlockSpec((chunk, Ho, Wo), lambda i: (i, 0, 0)),
        compiler_params=pltpu.CompilerParams(dimension_semantics=("parallel",)),
    )(xf)
    return out.reshape(N, C, Ho, Wo)


def _reference(x):
    # Pure-JAX reference of the three ConstantPad2d ops for validation.
    x = jnp.pad(x, ((0, 0), (0, 0), (2, 2), (2, 2)), constant_values=0.1)
    x = jnp.pad(x, ((0, 0), (0, 0), (5, 6), (3, 4)), constant_values=-2.0)
    x = jnp.pad(x, ((0, 0), (0, 0), (2, 0), (1, 0)), constant_values=0.0)
    return x


if __name__ == "__main__":
    key = jax.random.PRNGKey(0)
    x = jax.random.normal(key, (2, 4, 16, 16), dtype=jnp.float32)

    out = jax.block_until_ready(constant_pad2d_model(x))

    ref = _reference(x)
    assert out.shape == ref.shape, (out.shape, ref.shape)
    assert jnp.allclose(out, ref), "mismatch vs reference"

    print("KERNEL_OK")
</pallas_src>

<mosaic_0001>
module attributes {stable_mosaic.version = 11 : i64} {
  func.func @_pad_kernel(%arg0: i32, %arg1: memref<8x16x16xf32, #tpu.memory_space<vmem>>, %arg2: memref<8x33x28xf32, #tpu.memory_space<vmem>>) attributes {dimension_semantics = [#tpu.dimension_semantics<parallel>], iteration_bounds = array<i64: 1>, scalar_prefetch = 0 : i64, scratch_operands = 0 : i64, tpu.core_type = #tpu.core_type<tc>, window_params = [{transform_indices = @transform_0, window_bounds = array<i64: 8, 16, 16>}, {transform_indices = @transform_1, window_bounds = array<i64: 8, 33, 28>}]} {
    %0 = tpu.iota {dimensions = array<i32: 1>} : vector<1x33x28xi32>
    %1 = tpu.iota {dimensions = array<i32: 2>} : vector<1x33x28xi32>
    %c2_i32 = arith.constant 2 : i32
    %2 = vector.broadcast %c2_i32 : i32 to vector<1x33x28xi32>
    %3 = arith.cmpi sge, %0, %2 : vector<1x33x28xi32>
    %c1_i32 = arith.constant 1 : i32
    %4 = vector.broadcast %c1_i32 : i32 to vector<1x33x28xi32>
    %5 = arith.cmpi sge, %1, %4 : vector<1x33x28xi32>
    %6 = arith.andi %3, %5 : vector<1x33x28xi1>
    %c7_i32 = arith.constant 7 : i32
    %7 = vector.broadcast %c7_i32 : i32 to vector<1x33x28xi32>
    %8 = arith.cmpi sge, %0, %7 : vector<1x33x28xi32>
    %c27_i32 = arith.constant 27 : i32
    %9 = vector.broadcast %c27_i32 : i32 to vector<1x33x28xi32>
    %10 = arith.cmpi slt, %0, %9 : vector<1x33x28xi32>
    %11 = arith.andi %8, %10 : vector<1x33x28xi1>
    %c4_i32 = arith.constant 4 : i32
    %12 = vector.broadcast %c4_i32 : i32 to vector<1x33x28xi32>
    %13 = arith.cmpi sge, %1, %12 : vector<1x33x28xi32>
    %14 = arith.andi %11, %13 : vector<1x33x28xi1>
    %c24_i32 = arith.constant 24 : i32
    %15 = vector.broadcast %c24_i32 : i32 to vector<1x33x28xi32>
    %16 = arith.cmpi slt, %1, %15 : vector<1x33x28xi32>
    %17 = arith.andi %14, %16 : vector<1x33x28xi1>
    %cst = arith.constant -2.000000e+00 : f32
    %cst_0 = arith.constant 0.000000e+00 : f32
    %18 = vector.broadcast %cst : f32 to vector<1x33x28xf32>
    %19 = vector.broadcast %cst_0 : f32 to vector<1x33x28xf32>
    %20 = arith.select %6, %18, %19 : vector<1x33x28xi1>, vector<1x33x28xf32>
    %cst_1 = arith.constant 1.000000e-01 : f32
    %21 = vector.broadcast %cst_1 : f32 to vector<1x33x28xf32>
    %22 = arith.select %17, %21, %20 : vector<1x33x28xi1>, vector<1x33x28xf32>
    %23 = vector.shape_cast %22 : vector<1x33x28xf32> to vector<1x33x28xf32>
    %24 = vector.broadcast %23 : vector<1x33x28xf32> to vector<8x33x28xf32>
    %c0 = arith.constant 0 : index
    %c0_2 = arith.constant 0 : index
    %c0_3 = arith.constant 0 : index
    %25 = vector.load %arg2[%c0, %c0_2, %c0_3] : memref<8x33x28xf32, #tpu.memory_space<vmem>>, vector<8x33x28xf32>
    tpu.vector_store %arg2[%c0, %c0_2, %c0_3], %24 {strides = array<i32>} : memref<8x33x28xf32, #tpu.memory_space<vmem>>, vector<8x33x28xf32>,
    %c0_4 = arith.constant 0 : index
    %c0_5 = arith.constant 0 : index
    %c0_6 = arith.constant 0 : index
    %26 = vector.load %arg1[%c0_4, %c0_5, %c0_6] : memref<8x16x16xf32, #tpu.memory_space<vmem>>, vector<8x16x16xf32>
    %c0_7 = arith.constant 0 : index
    %c9 = arith.constant 9 : index
    %c6 = arith.constant 6 : index
    %27 = vector.load %arg2[%c0_7, %c9, %c6] : memref<8x33x28xf32, #tpu.memory_space<vmem>>, vector<8x16x16xf32>
    tpu.vector_store %arg2[%c0_7, %c9, %c6], %26 {strides = array<i32>} : memref<8x33x28xf32, #tpu.memory_space<vmem>>, vector<8x16x16xf32>,
    return
  }
  func.func @transform_0(%arg0: i32) -> (i32, i32, i32) {
    %c0_i32 = arith.constant 0 : i32
    %c0_i32_0 = arith.constant 0 : i32
    %c0_i32_1 = arith.constant 0 : i32
    return %arg0, %c0_i32, %c0_i32_0 : i32, i32, i32
  }
  func.func @transform_1(%arg0: i32) -> (i32, i32, i32) {
    %c0_i32 = arith.constant 0 : i32
    %c0_i32_0 = arith.constant 0 : i32
    %c0_i32_1 = arith.constant 0 : i32
    return %arg0, %c0_i32, %c0_i32_0 : i32, i32, i32
  }
}

</mosaic_0001>

<bundles_post_ra>
// kernel: tpu_custom_call.1
= control target key start
LH: loop header
LB: loop body
LE: loop exit
PB: predicated region body
PF: predicated region fallthrough
CT: control target
= control target key end

     0   :  { %6 = vsyncpa [#allocation3], 0  ;;  %s249_s6 = smov [#allocation2]   ;;  %s516_s0 = inlined_call_operand.hbm [shape: f32[8,16,16], index: 0, kind: input, shape index: {}]   ;;  %s517_s1 = inlined_call_operand.vmem [shape: f32[8,33,28], index: 1, kind: output, shape index: {}]  }
   0x1   :  { %s12_s7 = sshll.u32 %s249_s6, 4  ;;  %s13_s7 = int_to_ptr.vmem [resolvable:$true] %s12_s7 }
   0x2   :  { %s235_s8 = scalar_lea.vmem %s13_s7, 2048  ;;  %p240_p1 = scmp.lt.s32.totalorder %s13_s7, %s13_s7 }
   0x3   :  { %p236_p0 = scmp.ne.s32.totalorder %s13_s7, %s235_s8  ;;  %p241_p2 = scmp.lt.s32.totalorder %s235_s8, %s235_s8 }
   0x5   :  { %p242_p3 = por %p241_p2, %p240_p1 }
   0x7   :  { %p243_p4 = pnand %p242_p3, %p236_p0 }
   0x9   :  { %246 = shalt.err (!%p243_p4)
}
   0xa   :  { %s250_s9 = smov 128   ;;  %s251_s10 = smov 8  }
   0xb   :  { %18 = dma.hbm_to_vmem [thread:$0]  %s516_s0, 2048, %s13_s7, [#allocation3], %s250_s9, %s250_s9, %s251_s10  }
   0xc   :  { %247 = dma.done.wait [#allocation3], 2048  }
   0xd   :  { %248 = vsyncadd [#allocation3], 4294965248  ;;  %v22_v0 = vlaneseq  ;;  %vm83_vm0 = vcmask 221184   ;;  %vm78_vm4 = vcmask 228352   ;;  %v252_v3 = vmov 0.0   ;;  %v122_v7 = vld [vmem:[#allocation2 + $0x10] sm:$0xff] }
   0xe   :  { %v120_v8 = vld [vmem:[#allocation2] sm:$0xff]  ;;  %s253_s30 = smov 6   ;;  %v123_v9 = vld [vmem:[#allocation2 + $0x18] sm:$0xff]  ;;  %v121_v10 = vld [vmem:[#allocation2 + $0x8] sm:$0xff]  ;;  %vm200_vm14 = vcmask 179248  }
   0xf   :  { %v29_v1 = vand.u32 127, %v22_v0  ;;  %v23_v2 = vshrl.u32 %v22_v0, 7  ;;  %156 = vrot.lane.b32.xlu1 %v122_v7, %s253_s30  ;;  %152 = vrot.lane.b32.xlu0 %v120_v8, %s253_s30  ;;  %v125_v12 = vld [vmem:[#allocation2 + $0x28] sm:$0xff]  ;;  %v124_v13 = vld [vmem:[#allocation2 + $0x20] sm:$0xff]  ;;  %v127_v16 = vld [vmem:[#allocation2 + $0x38] sm:$0xff] }
  0x10   :  { %v126_v17 = vld [vmem:[#allocation2 + $0x30] sm:$0xff]  ;;  %v129_v18 = vld [vmem:[#allocation2 + $0x48] sm:$0xff]  ;;  %v128_v19 = vld [vmem:[#allocation2 + $0x40] sm:$0xff] }
  0x11   :  { %vm35_vm1 = vcmp.ge.s32.totalorder %v29_v1, 1  ;;  %vm56_vm2 = vcmp.ge.s32.totalorder %v29_v1, 4  ;;  %vm62_vm3 = vcmp.lt.s32.totalorder %v29_v1, 24  ;;  %v26_v6 = vadd.s32 24, %v23_v2  ;;  %v131_v20 = vld [vmem:[#allocation2 + $0x58] sm:$0xff]  ;;  %v130_v21 = vld [vmem:[#allocation2 + $0x50] sm:$0xff] }
  0x12   :  { %vm64_vm5 = vmand %vm56_vm2, %vm62_vm3  ;;  %v69_v4 = vsel %vm35_vm1, -2.0, %v252_v3  ;;  %vm30_vm6 = vcmp.ge.s32.totalorder %v23_v2, 2  ;;  %vm41_vm8 = vcmp.ge.s32.totalorder %v23_v2, 7  ;;  %v133_v22 = vld [vmem:[#allocation2 + $0x68] sm:$0xff]  ;;  %v132_v23 = vld [vmem:[#allocation2 + $0x60] sm:$0xff] }
  0x13   :  { %v74_v5 = vsel %vm64_vm5, 0.1, %v69_v4  ;;  %84 = vst.msk [vmem:[%s517_s1 + $0x20] sm:$0x1] %vm83_vm0, %v69_v4  ;;  %89 = vst.msk [vmem:[%s517_s1 + $0x48] sm:$0x1] %vm83_vm0, %v69_v4  ;;  %158 = vrot.lane.b32.xlu1 %v123_v9, %s253_s30  ;;  %154 = vrot.lane.b32.xlu0 %v121_v10, %s253_s30 }
  0x14   :  { %94 = vst.msk [vmem:[%s517_s1 + $0x70] sm:$0x1] %vm83_vm0, %v69_v4  ;;  %99 = vst.msk [vmem:[%s517_s1 + $0x98] sm:$0x1] %vm83_vm0, %v69_v4  ;;  %vm49_vm9 = vcmp.lt.s32.totalorder %v26_v6, 27  ;;  %v135_v24 = vld [vmem:[#allocation2 + $0x78] sm:$0xff] }
  0x15   :  { %104 = vst.msk [vmem:[%s517_s1 + $0xc0] sm:$0x1] %vm83_vm0, %v69_v4  ;;  %109 = vst.msk [vmem:[%s517_s1 + $0xe8] sm:$0x1] %vm83_vm0, %v69_v4  ;;  %v134_v25 = vld [vmem:[#allocation2 + $0x70] sm:$0xff] }
  0x16   :  { %114 = vst.msk [vmem:[%s517_s1 + $0x110] sm:$0x1] %vm83_vm0, %v69_v4  ;;  %119 = vst.msk [vmem:[%s517_s1 + $0x138] sm:$0x1] %vm83_vm0, %v69_v4 }
  0x17   :  { %86 = vst.msk [vmem:[%s517_s1 + $0x30] sm:$0xff] %vm78_vm4, %v74_v5  ;;  %87 = vst.msk [vmem:[%s517_s1 + $0x38] sm:$0xff] %vm78_vm4, %v74_v5  ;;  %162 = vrot.lane.b32.xlu1 %v125_v12, %s253_s30  ;;  %160 = vrot.lane.b32.xlu0 %v124_v13, %s253_s30 }
  0x18   :  { %80 = vst.msk [vmem:[%s517_s1 + $0x8] sm:$0xff] %vm78_vm4, %v74_v5  ;;  %81 = vst.msk [vmem:[%s517_s1 + $0x10] sm:$0xff] %vm78_vm4, %v74_v5 }
  0x19   :  { %91 = vst.msk [vmem:[%s517_s1 + $0x58] sm:$0xff] %vm78_vm4, %v74_v5  ;;  %92 = vst.msk [vmem:[%s517_s1 + $0x60] sm:$0xff] %vm78_vm4, %v74_v5 }
  0x1a   :  { %96 = vst.msk [vmem:[%s517_s1 + $0x80] sm:$0xff] %vm78_vm4, %v74_v5  ;;  %97 = vst.msk [vmem:[%s517_s1 + $0x88] sm:$0xff] %vm78_vm4, %v74_v5 }
  0x1b   :  { %101 = vst.msk [vmem:[%s517_s1 + $0xa8] sm:$0xff] %vm78_vm4, %v74_v5  ;;  %102 = vst.msk [vmem:[%s517_s1 + $0xb0] sm:$0xff] %vm78_vm4, %v74_v5  ;;  %166 = vrot.lane.b32.xlu1 %v127_v16, %s253_s30  ;;  %164 = vrot.lane.b32.xlu0 %v126_v17, %s253_s30 }
  0x1c   :  { %106 = vst.msk [vmem:[%s517_s1 + $0xd0] sm:$0xff] %vm78_vm4, %v74_v5  ;;  %107 = vst.msk [vmem:[%s517_s1 + $0xd8] sm:$0xff] %vm78_vm4, %v74_v5 }
  0x1d   :  { %111 = vst.msk [vmem:[%s517_s1 + $0xf8] sm:$0xff] %vm78_vm4, %v74_v5  ;;  %112 = vst.msk [vmem:[%s517_s1 + $0x100] sm:$0xff] %vm78_vm4, %v74_v5 }
  0x1e   :  { %116 = vst.msk [vmem:[%s517_s1 + $0x120] sm:$0xff] %vm78_vm4, %v74_v5  ;;  %117 = vst.msk [vmem:[%s517_s1 + $0x128] sm:$0xff] %vm78_vm4, %v74_v5 }
  0x1f   :  { %vm36_vm7 = vmand %vm30_vm6, %vm35_vm1  ;;  %170 = vrot.lane.b32.xlu1 %v129_v18, %s253_s30  ;;  %168 = vrot.lane.b32.xlu0 %v128_v19, %s253_s30 }
  0x20   :  { %vm57_vm10 = vmand %vm41_vm8, %vm56_vm2  ;;  %v68_v11 = vsel %vm36_vm7, -2.0, %v252_v3 }
  0x21   :  { %vm60_vm11 = vmand %vm49_vm9, %vm56_vm2 }
  0x22   :  { %vm63_vm12 = vmand %vm57_vm10, %vm62_vm3 }
  0x23   :  { %vm66_vm13 = vmand %vm60_vm11, %vm62_vm3  ;;  %v73_v14 = vsel %vm63_vm12, 0.1, %v68_v11  ;;  %174 = vrot.lane.b32.xlu1 %v131_v20, %s253_s30  ;;  %172 = vrot.lane.b32.xlu0 %v130_v21, %s253_s30 }
  0x24   :  { %v76_v15 = vsel %vm66_vm13, 0.1, %v69_v4  ;;  %79 = vst.msk [vmem:[%s517_s1] sm:$0xff] %vm78_vm4, %v73_v14  ;;  %85 = vst.msk [vmem:[%s517_s1 + $0x28] sm:$0xff] %vm78_vm4, %v73_v14 }
  0x25   :  { %90 = vst.msk [vmem:[%s517_s1 + $0x50] sm:$0xff] %vm78_vm4, %v73_v14  ;;  %95 = vst.msk [vmem:[%s517_s1 + $0x78] sm:$0xff] %vm78_vm4, %v73_v14 }
  0x26   :  { %100 = vst.msk [vmem:[%s517_s1 + $0xa0] sm:$0xff] %vm78_vm4, %v73_v14  ;;  %105 = vst.msk [vmem:[%s517_s1 + $0xc8] sm:$0xff] %vm78_vm4, %v73_v14 }
  0x27   :  { %110 = vst.msk [vmem:[%s517_s1 + $0xf0] sm:$0xff] %vm78_vm4, %v73_v14  ;;  %115 = vst.msk [vmem:[%s517_s1 + $0x118] sm:$0xff] %vm78_vm4, %v73_v14  ;;  %178 = vrot.lane.b32.xlu1 %v133_v22, %s253_s30  ;;  %176 = vrot.lane.b32.xlu0 %v132_v23, %s253_s30 }
  0x28   :  { %88 = vst.msk [vmem:[%s517_s1 + $0x40] sm:$0xff] %vm78_vm4, %v76_v15  ;;  %82 = vst.msk [vmem:[%s517_s1 + $0x18] sm:$0xff] %vm78_vm4, %v76_v15 }
  0x29   :  { %93 = vst.msk [vmem:[%s517_s1 + $0x68] sm:$0xff] %vm78_vm4, %v76_v15  ;;  %98 = vst.msk [vmem:[%s517_s1 + $0x90] sm:$0xff] %vm78_vm4, %v76_v15 }
  0x2a   :  { %103 = vst.msk [vmem:[%s517_s1 + $0xb8] sm:$0xff] %vm78_vm4, %v76_v15  ;;  %108 = vst.msk [vmem:[%s517_s1 + $0xe0] sm:$0xff] %vm78_vm4, %v76_v15 }
  0x2b   :  { %113 = vst.msk [vmem:[%s517_s1 + $0x108] sm:$0xff] %vm78_vm4, %v76_v15  ;;  %118 = vst.msk [vmem:[%s517_s1 + $0x130] sm:$0xff] %vm78_vm4, %v76_v15  ;;  %182 = vrot.lane.b32.xlu1 %v135_v24, %s253_s30  ;;  %180 = vrot.lane.b32.xlu0 %v134_v25, %s253_s30 }
  0x81   :  { %v157_v26 = vpop.permute.xlu1 %156  ;;  %v153_v27 = vpop.permute.xlu0 %152 }
  0x82   :  { %203 = vst.msk [vmem:[%s517_s1 + $0x31] sm:$0xff] %vm200_vm14, %v157_v26  ;;  %201 = vst.msk [vmem:[%s517_s1 + $0x9] sm:$0xff] %vm200_vm14, %v153_v27 }
  0x85   :  { %v159_v28 = vpop.permute.xlu1 %158  ;;  %v155_v29 = vpop.permute.xlu0 %154 }
  0x86   :  { %204 = vst.msk [vmem:[%s517_s1 + $0x39] sm:$0xff] %vm200_vm14, %v159_v28  ;;  %202 = vst.msk [vmem:[%s517_s1 + $0x11] sm:$0xff] %vm200_vm14, %v155_v29 }
  0x89   :  { %v163_v30 = vpop.permute.xlu1 %162  ;;  %v161_v31 = vpop.permute.xlu0 %160 }
  0x8a   :  { %206 = vst.msk [vmem:[%s517_s1 + $0x61] sm:$0xff] %vm200_vm14, %v163_v30  ;;  %205 = vst.msk [vmem:[%s517_s1 + $0x59] sm:$0xff] %vm200_vm14, %v161_v31 }
  0x8d   :  { %v167_v32 = vpop.permute.xlu1 %166  ;;  %v165_v33 = vpop.permute.xlu0 %164 }
  0x8e   :  { %208 = vst.msk [vmem:[%s517_s1 + $0x89] sm:$0xff] %vm200_vm14, %v167_v32  ;;  %207 = vst.msk [vmem:[%s517_s1 + $0x81] sm:$0xff] %vm200_vm14, %v165_v33 }
  0x91   :  { %v171_v34 = vpop.permute.xlu1 %170  ;;  %v169_v35 = vpop.permute.xlu0 %168 }
  0x92   :  { %210 = vst.msk [vmem:[%s517_s1 + $0xb1] sm:$0xff] %vm200_vm14, %v171_v34  ;;  %209 = vst.msk [vmem:[%s517_s1 + $0xa9] sm:$0xff] %vm200_vm14, %v169_v35 }
  0x95   :  { %v175_v36 = vpop.permute.xlu1 %174  ;;  %v173_v37 = vpop.permute.xlu0 %172 }
  0x96   :  { %212 = vst.msk [vmem:[%s517_s1 + $0xd9] sm:$0xff] %vm200_vm14, %v175_v36  ;;  %211 = vst.msk [vmem:[%s517_s1 + $0xd1] sm:$0xff] %vm200_vm14, %v173_v37 }
  0x99   :  { %v179_v38 = vpop.permute.xlu1 %178  ;;  %v177_v39 = vpop.permute.xlu0 %176 }
  0x9a   :  { %214 = vst.msk [vmem:[%s517_s1 + $0x101] sm:$0xff] %vm200_vm14, %v179_v38  ;;  %213 = vst.msk [vmem:[%s517_s1 + $0xf9] sm:$0xff] %vm200_vm14, %v177_v39 }
  0x9d   :  { %v183_v40 = vpop.permute.xlu1 %182  ;;  %v181_v41 = vpop.permute.xlu0 %180 }
  0x9e   :  { %216 = vst.msk [vmem:[%s517_s1 + $0x129] sm:$0xff] %vm200_vm14, %v183_v40  ;;  %215 = vst.msk [vmem:[%s517_s1 + $0x121] sm:$0xff] %vm200_vm14, %v181_v41 }
  0x9f   :  { %221 = vsyncpa [#allocation3], 1 }

</bundles_post_ra>
